<compile_context>
chip_gen: v6e
topology: v6e:2x2x1
jax: 0.10.0
libtpu: 0.0.40
codegen_flags: <defaults>
</compile_context>

<pallas_src>
import functools
import math

import jax
import jax.numpy as jnp
from jax.experimental import pallas as pl
from jax.experimental.pallas import tpu as pltpu


# ---------------------------------------------------------------------------
# host-side helpers (tiny linear-map matrices, row-tile sizing)
# ---------------------------------------------------------------------------

def _adaptive_pool_matrix(in_size: int, out_size: int):
    """(out_size, in_size) row-stochastic matrix reproducing AdaptiveAvgPool1d."""
    i = jnp.arange(out_size, dtype=jnp.int32)
    starts = (i * in_size) // out_size
    ends = ((i + 1) * in_size + out_size - 1) // out_size
    cols = jnp.arange(in_size, dtype=jnp.int32)
    mask = (cols[None, :] >= starts[:, None]) & (cols[None, :] < ends[:, None])
    return mask.astype(jnp.float32) / (ends - starts).astype(jnp.float32)[:, None]


def _bilinear_up_matrix(in_size: int, out_size: int):
    """(out_size, in_size) matrix reproducing F.upsample_bilinear
    (bilinear, align_corners=True) along one axis."""
    i = jnp.arange(out_size, dtype=jnp.float32)
    if out_size == 1:
        src = jnp.zeros_like(i)
    else:
        src = i * ((in_size - 1) / (out_size - 1))
    idx0 = jnp.clip(jnp.floor(src).astype(jnp.int32), 0, in_size - 1)
    idx1 = jnp.clip(idx0 + 1, 0, in_size - 1)
    lam = src - idx0.astype(jnp.float32)
    m0 = jax.nn.one_hot(idx0, in_size, dtype=jnp.float32) * (1.0 - lam)[:, None]
    m1 = jax.nn.one_hot(idx1, in_size, dtype=jnp.float32) * lam[:, None]
    return m0 + m1


def _row_tile(n_rows: int, bytes_per_row: int,
              budget_bytes: int = 2 * 1024 * 1024) -> int:
    """Rows per block: as many as fit the per-buffer budget; multiple of 8 when tiling."""
    cap = max(8, budget_bytes // max(int(bytes_per_row), 1))
    cap = min(cap, 2048)
    if n_rows <= cap:
        return int(n_rows)
    return int((cap // 8) * 8)


# ---------------------------------------------------------------------------
# kernels
# ---------------------------------------------------------------------------

def _global_pool_kernel(x_ref, o_ref, *, inv_n):
    # Avg_size == 1: per-row mean.  x_ref: (TR, H*W); o_ref: (TR, 1) f32.
    o_ref[...] = jnp.sum(x_ref[...].astype(jnp.float32), axis=1, keepdims=True) * inv_n


def _kron_pool_kernel(x_ref, kp_ref, o_ref):
    # Avg_size > 1: adaptive avg pool as a Kronecker GEMM.
    # x_ref: (TR, H*W); kp_ref: (H*W, A*A); o_ref: (TR, A*A) f32.
    o_ref[...] = jnp.dot(x_ref[...], kp_ref[...], preferred_element_type=jnp.float32)


def _se_mlp_kernel(p_ref, w1_ref, b1_ref, w2_ref, b2_ref, o_ref):
    # p: (R, Cin) f32; w1: (Cin, S); b1: (1, S); w2: (S, Cout); b2: (1, Cout)
    h = jnp.dot(p_ref[...], w1_ref[...], preferred_element_type=jnp.float32) + b1_ref[...]
    h = h * jax.nn.sigmoid(h)                                   # swish
    o_ref[...] = jnp.dot(h, w2_ref[...], preferred_element_type=jnp.float32) + b2_ref[...]


def _gate_bcast_kernel(y_ref, z_ref, o_ref):
    # Avg_size == 1: per-(batch, channel) scalar gate broadcast over H*W lanes.
    g = jax.nn.sigmoid(y_ref[...])                              # (TR, 1) f32
    o_ref[...] = (g * z_ref[...]).astype(o_ref.dtype)


def _gate_upsample_kernel(y_ref, ku_ref, z_ref, o_ref):
    # Avg_size > 1: bilinear(align_corners=True) upsample as one Kron GEMM,
    # fused with sigmoid and the elementwise gating of z.
    logits = jnp.dot(y_ref[...], ku_ref[...], preferred_element_type=jnp.float32)
    o_ref[...] = (jax.nn.sigmoid(logits) * z_ref[...]).astype(o_ref.dtype)


# ---------------------------------------------------------------------------
# wrapper
# ---------------------------------------------------------------------------

@functools.partial(jax.jit, static_argnames=("avg_size",))
def se_module_diff_pallas(x, z, w_reduce, b_reduce, w_expand, b_expand, *, avg_size=1):
    """Pallas TPU forward of Se_module_diff.

    x: (B, Cin, H, W)         -- drives the squeeze/excite gate
    z: (B, Cout, Hz, Wz)      -- tensor being gated (output shape)
    w_reduce: (S, Cin), b_reduce: (S,)      -- 1x1 conv _se_reduce
    w_expand: (Cout, S), b_expand: (Cout,)  -- 1x1 conv _se_expand
    """
    B, Cin, H, W = x.shape
    Bz, Cout, Hz, Wz = z.shape
    assert B == Bz
    S = w_reduce.shape[0]
    assert w_reduce.shape == (S, Cin) and w_expand.shape == (Cout, S)
    A = int(avg_size)
    A2 = A * A
    HW = H * W
    N = Hz * Wz
    f32 = jnp.float32
    par = pltpu.CompilerParams(dimension_semantics=("parallel",))

    # ---- 1) adaptive average pool: x (B*Cin, H*W) -> pooled (B*Cin, A*A) ----
    R = B * Cin
    x2 = x.reshape(R, HW)
    tr = _row_tile(R, HW * jnp.dtype(x.dtype).itemsize)
    if A == 1:
        pooled = pl.pallas_call(
            functools.partial(_global_pool_kernel, inv_n=1.0 / HW),
            out_shape=jax.ShapeDtypeStruct((R, 1), f32),
            grid_spec=pltpu.PrefetchScalarGridSpec(
                num_scalar_prefetch=0,
                grid=(pl.cdiv(R, tr),),
                in_specs=[pl.BlockSpec((tr, HW), lambda i: (i, 0))],
                out_specs=pl.BlockSpec((tr, 1), lambda i: (i, 0))),
            compiler_params=par,
        )(x2)
    else:
        ph = _adaptive_pool_matrix(H, A)
        pw = _adaptive_pool_matrix(W, A)
        kp = jnp.kron(ph, pw).T.astype(x.dtype)                 # (H*W, A*A)
        pooled = pl.pallas_call(
            _kron_pool_kernel,
            out_shape=jax.ShapeDtypeStruct((R, A2), f32),
            grid_spec=pltpu.PrefetchScalarGridSpec(
                num_scalar_prefetch=0,
                grid=(pl.cdiv(R, tr),),
                in_specs=[pl.BlockSpec((tr, HW), lambda i: (i, 0)),
                          pl.BlockSpec((HW, A2), lambda i: (0, 0))],
                out_specs=pl.BlockSpec((tr, A2), lambda i: (i, 0))),
            compiler_params=par,
        )(x2, kp)

    # ---- 2) squeeze / excite 1x1-conv MLP on the tiny pooled tensor ---------
    # 1x1 convs act per (batch, spatial) position over channels.
    p = pooled.reshape(B, Cin, A, A).transpose(0, 2, 3, 1).reshape(B * A2, Cin)
    Rm = B * A2
    Rm_pad = max(8, ((Rm + 7) // 8) * 8)
    p = jnp.pad(p, ((0, Rm_pad - Rm), (0, 0)))
    w1 = w_reduce.T.astype(f32)                                 # (Cin, S)
    b1 = b_reduce.reshape(1, S).astype(f32)
    w2 = w_expand.T.astype(f32)                                 # (S, Cout)
    b2 = b_expand.reshape(1, Cout).astype(f32)

    def full(shape):
        return pl.BlockSpec(shape, lambda i: (0,) * len(shape))

    y = pl.pallas_call(
        _se_mlp_kernel,
        out_shape=jax.ShapeDtypeStruct((Rm_pad, Cout), f32),
        grid_spec=pltpu.PrefetchScalarGridSpec(
            num_scalar_prefetch=0,
            grid=(1,),
            in_specs=[full((Rm_pad, Cin)), full((Cin, S)), full((1, S)),
                      full((S, Cout)), full((1, Cout))],
            out_specs=full((Rm_pad, Cout))),
    )(p, w1, b1, w2, b2)
    y = y[:Rm]

    # ---- 3) gate z: sigmoid(upsample(y)) * z, fused & lane-dense ------------
    Rz = B * Cout
    z2 = z.reshape(Rz, N)
    # (b, i, j, c_out) rows -> (b, c_out) rows with A*A gate logits per row.
    y_g = y.reshape(B, A, A, Cout).transpose(0, 3, 1, 2).reshape(Rz, A2)
    trz = _row_tile(Rz, N * jnp.dtype(z.dtype).itemsize)
    if A == 1:
        out2 = pl.pallas_call(
            _gate_bcast_kernel,
            out_shape=jax.ShapeDtypeStruct((Rz, N), z.dtype),
            grid_spec=pltpu.PrefetchScalarGridSpec(
                num_scalar_prefetch=0,
                grid=(pl.cdiv(Rz, trz),),
                in_specs=[pl.BlockSpec((trz, 1), lambda i: (i, 0)),
                          pl.BlockSpec((trz, N), lambda i: (i, 0))],
                out_specs=pl.BlockSpec((trz, N), lambda i: (i, 0))),
            compiler_params=par,
        )(y_g, z2)
    else:
        uh = _bilinear_up_matrix(A, Hz)
        uw = _bilinear_up_matrix(A, Wz)
        ku = jnp.kron(uh, uw).T.astype(f32)                     # (A*A, Hz*Wz)
        out2 = pl.pallas_call(
            _gate_upsample_kernel,
            out_shape=jax.ShapeDtypeStruct((Rz, N), z.dtype),
            grid_spec=pltpu.PrefetchScalarGridSpec(
                num_scalar_prefetch=0,
                grid=(pl.cdiv(Rz, trz),),
                in_specs=[pl.BlockSpec((trz, A2), lambda i: (i, 0)),
                          pl.BlockSpec((A2, N), lambda i: (0, 0)),
                          pl.BlockSpec((trz, N), lambda i: (i, 0))],
                out_specs=pl.BlockSpec((trz, N), lambda i: (i, 0))),
            compiler_params=par,
        )(y_g, ku, z2)

    return out2.reshape(B, Cout, Hz, Wz)


# ---------------------------------------------------------------------------
# test
# ---------------------------------------------------------------------------

if __name__ == "__main__":
    key = jax.random.PRNGKey(0)
    B, Cin, Cout, H, W = 2, 16, 16, 16, 16
    se_ratio = 4
    S = max(1, Cin // se_ratio)

    kx, kz, k1, k2 = jax.random.split(key, 4)
    x = jax.random.normal(kx, (B, Cin, H, W), dtype=jnp.float32)
    z = jax.random.normal(kz, (B, Cout, H, W), dtype=jnp.float32)
    # 1x1 conv params, initialized like reset_parameters: N(0, sqrt(2/(k*k*out_ch))), bias 0
    w_reduce = jax.random.normal(k1, (S, Cin), dtype=jnp.float32) * math.sqrt(2.0 / S)
    b_reduce = jnp.zeros((S,), jnp.float32)
    w_expand = jax.random.normal(k2, (Cout, S), dtype=jnp.float32) * math.sqrt(2.0 / Cout)
    b_expand = jnp.zeros((Cout,), jnp.float32)

    hi = jax.lax.Precision.HIGHEST

    # ---- Avg_size = 1 (module default): global SE gating, no upsample -------
    out = se_module_diff_pallas(x, z, w_reduce, b_reduce, w_expand, b_expand, avg_size=1)
    out = jax.block_until_ready(out)
    assert out.shape == z.shape, out.shape

    pooled = x.mean(axis=(2, 3))
    h = jnp.dot(pooled, w_reduce.T, precision=hi) + b_reduce
    h = h * jax.nn.sigmoid(h)
    yref = jnp.dot(h, w_expand.T, precision=hi) + b_expand
    ref = jax.nn.sigmoid(yref)[:, :, None, None] * z
    assert jnp.allclose(out, ref, atol=1e-3, rtol=1e-3), float(jnp.max(jnp.abs(out - ref)))

    # ---- Avg_size = 2: adaptive pool + bilinear(align_corners=True) upsample -
    out2 = se_module_diff_pallas(x, z, w_reduce, b_reduce, w_expand, b_expand, avg_size=2)
    out2 = jax.block_until_ready(out2)
    A = 2
    ph = _adaptive_pool_matrix(H, A)
    pw = _adaptive_pool_matrix(W, A)
    p2 = jnp.einsum("ah,bchw,dw->bcad", ph, x, pw, precision=hi)
    h2 = jnp.einsum("sc,bcad->bsad", w_reduce, p2, precision=hi) + b_reduce[None, :, None, None]
    h2 = h2 * jax.nn.sigmoid(h2)
    y2 = jnp.einsum("os,bsad->boad", w_expand, h2, precision=hi) + b_expand[None, :, None, None]
    uh = _bilinear_up_matrix(A, H)
    uw = _bilinear_up_matrix(A, W)
    y2u = jnp.einsum("Ha,boad,Wd->boHW", uh, y2, uw, precision=hi)
    ref2 = jax.nn.sigmoid(y2u) * z
    assert jnp.allclose(out2, ref2, atol=1e-3, rtol=1e-3), float(jnp.max(jnp.abs(out2 - ref2)))

    print("KERNEL_OK")
</pallas_src>

<mosaic_0001>
module attributes {stable_mosaic.version = 11 : i64} {
  func.func @_global_pool_kernel(%arg0: i32, %arg1: memref<32x256xf32, #tpu.memory_space<vmem>>, %arg2: memref<32x1xf32, #tpu.memory_space<vmem>>) attributes {dimension_semantics = [#tpu.dimension_semantics<parallel>], iteration_bounds = array<i64: 1>, scalar_prefetch = 0 : i64, scratch_operands = 0 : i64, tpu.core_type = #tpu.core_type<tc>, window_params = [{transform_indices = @transform_0, window_bounds = array<i64: 32, 256>}, {transform_indices = @transform_1, window_bounds = array<i64: 32, 1>}]} {
    %c0 = arith.constant 0 : index
    %c0_0 = arith.constant 0 : index
    %0 = vector.load %arg1[%c0, %c0_0] : memref<32x256xf32, #tpu.memory_space<vmem>>, vector<32x256xf32>
    %cst = arith.constant dense<0.000000e+00> : vector<32xf32>
    %1 = vector.multi_reduction <add>, %0, %cst [1] : vector<32x256xf32> to vector<32xf32>
    %2 = vector.shape_cast %1 : vector<32xf32> to vector<32x1xf32>
    %cst_1 = arith.constant 3.906250e-03 : f32
    %3 = vector.broadcast %cst_1 : f32 to vector<32x1xf32>
    %4 = arith.mulf %2, %3 : vector<32x1xf32>
    %c0_2 = arith.constant 0 : index
    %c0_3 = arith.constant 0 : index
    %5 = vector.load %arg2[%c0_2, %c0_3] : memref<32x1xf32, #tpu.memory_space<vmem>>, vector<32x1xf32>
    tpu.vector_store %arg2[%c0_2, %c0_3], %4 {strides = array<i32>} : memref<32x1xf32, #tpu.memory_space<vmem>>, vector<32x1xf32>,
    return
  }
  func.func @transform_0(%arg0: i32) -> (i32, i32) {
    %c0_i32 = arith.constant 0 : i32
    %c0_i32_0 = arith.constant 0 : i32
    return %arg0, %c0_i32 : i32, i32
  }
  func.func @transform_1(%arg0: i32) -> (i32, i32) {
    %c0_i32 = arith.constant 0 : i32
    %c0_i32_0 = arith.constant 0 : i32
    return %arg0, %c0_i32 : i32, i32
  }
}

module attributes {stable_mosaic.version = 11 : i64} {
  func.func @_se_mlp_kernel(%arg0: i32, %arg1: memref<8x16xf32, #tpu.memory_space<vmem>>, %arg2: memref<16x4xf32, #tpu.memory_space<vmem>>, %arg3: memref<1x4xf32, #tpu.memory_space<vmem>>, %arg4: memref<4x16xf32, #tpu.memory_space<vmem>>, %arg5: memref<1x16xf32, #tpu.memory_space<vmem>>, %arg6: memref<8x16xf32, #tpu.memory_space<vmem>>) attributes {dimension_semantics = [#tpu.dimension_semantics<arbitrary>], iteration_bounds = array<i64: 1>, scalar_prefetch = 0 : i64, scratch_operands = 0 : i64, tpu.core_type = #tpu.core_type<tc>, window_params = [{pipeline_mode = #tpu.pipeline_mode<synchronous>, transform_indices = @transform_0, window_bounds = array<i64: 8, 16>}, {pipeline_mode = #tpu.pipeline_mode<synchronous>, transform_indices = @transform_1, window_bounds = array<i64: 16, 4>}, {pipeline_mode = #tpu.pipeline_mode<synchronous>, transform_indices = @transform_2, window_bounds = array<i64: 1, 4>}, {pipeline_mode = #tpu.pipeline_mode<synchronous>, transform_indices = @transform_3, window_bounds = array<i64: 4, 16>}, {pipeline_mode = #tpu.pipeline_mode<synchronous>, transform_indices = @transform_4, window_bounds = array<i64: 1, 16>}, {pipeline_mode = #tpu.pipeline_mode<synchronous>, transform_indices = @transform_5, window_bounds = array<i64: 8, 16>}]} {
    %c0 = arith.constant 0 : index
    %c0_0 = arith.constant 0 : index
    %0 = vector.load %arg1[%c0, %c0_0] : memref<8x16xf32, #tpu.memory_space<vmem>>, vector<8x16xf32>
    %c0_1 = arith.constant 0 : index
    %c0_2 = arith.constant 0 : index
    %1 = vector.load %arg2[%c0_1, %c0_2] : memref<16x4xf32, #tpu.memory_space<vmem>>, vector<16x4xf32>
    %cst = arith.constant dense<0.000000e+00> : vector<8x4xf32>
    %2 = tpu.matmul %0, %1, %cst {dimension_numbers = #tpu.dot_dimension_numbers<[1], [0], [0], [1], [0, 0, 1, 1], [], []>} : vector<8x16xf32>, vector<16x4xf32>, vector<8x4xf32> -> vector<8x4xf32>
    %c0_3 = arith.constant 0 : index
    %c0_4 = arith.constant 0 : index
    %3 = vector.load %arg3[%c0_3, %c0_4] : memref<1x4xf32, #tpu.memory_space<vmem>>, vector<1x4xf32>
    %4 = vector.broadcast %3 : vector<1x4xf32> to vector<8x4xf32>
    %5 = arith.addf %2, %4 : vector<8x4xf32>
    %6 = arith.negf %5 : vector<8x4xf32>
    %7 = math.exp %6 : vector<8x4xf32>
    %cst_5 = arith.constant 1.000000e+00 : f32
    %8 = vector.broadcast %cst_5 : f32 to vector<8x4xf32>
    %9 = arith.addf %8, %7 : vector<8x4xf32>
    %10 = arith.divf %8, %9 : vector<8x4xf32>
    %11 = arith.mulf %5, %10 : vector<8x4xf32>
    %c0_6 = arith.constant 0 : index
    %c0_7 = arith.constant 0 : index
    %12 = vector.load %arg4[%c0_6, %c0_7] : memref<4x16xf32, #tpu.memory_space<vmem>>, vector<4x16xf32>
    %cst_8 = arith.constant dense<0.000000e+00> : vector<8x16xf32>
    %13 = tpu.matmul %11, %12, %cst_8 {dimension_numbers = #tpu.dot_dimension_numbers<[1], [0], [0], [1], [0, 0, 1, 1], [], []>} : vector<8x4xf32>, vector<4x16xf32>, vector<8x16xf32> -> vector<8x16xf32>
    %c0_9 = arith.constant 0 : index
    %c0_10 = arith.constant 0 : index
    %14 = vector.load %arg5[%c0_9, %c0_10] : memref<1x16xf32, #tpu.memory_space<vmem>>, vector<1x16xf32>
    %15 = vector.broadcast %14 : vector<1x16xf32> to vector<8x16xf32>
    %16 = arith.addf %13, %15 : vector<8x16xf32>
    %c0_11 = arith.constant 0 : index
    %c0_12 = arith.constant 0 : index
    %17 = vector.load %arg6[%c0_11, %c0_12] : memref<8x16xf32, #tpu.memory_space<vmem>>, vector<8x16xf32>
    tpu.vector_store %arg6[%c0_11, %c0_12], %16 {strides = array<i32>} : memref<8x16xf32, #tpu.memory_space<vmem>>, vector<8x16xf32>,
    return
  }
  func.func @transform_0(%arg0: i32) -> (i32, i32) {
    %c0_i32 = arith.constant 0 : i32
    %c0_i32_0 = arith.constant 0 : i32
    %c0_i32_1 = arith.constant 0 : i32
    return %c0_i32, %c0_i32_0 : i32, i32
  }
  func.func @transform_1(%arg0: i32) -> (i32, i32) {
    %c0_i32 = arith.constant 0 : i32
    %c0_i32_0 = arith.constant 0 : i32
    %c0_i32_1 = arith.constant 0 : i32
    return %c0_i32, %c0_i32_0 : i32, i32
  }
  func.func @transform_2(%arg0: i32) -> (i32, i32) {
    %c0_i32 = arith.constant 0 : i32
    %c0_i32_0 = arith.constant 0 : i32
    %c0_i32_1 = arith.constant 0 : i32
    return %c0_i32, %c0_i32_0 : i32, i32
  }
  func.func @transform_3(%arg0: i32) -> (i32, i32) {
    %c0_i32 = arith.constant 0 : i32
    %c0_i32_0 = arith.constant 0 : i32
    %c0_i32_1 = arith.constant 0 : i32
    return %c0_i32, %c0_i32_0 : i32, i32
  }
  func.func @transform_4(%arg0: i32) -> (i32, i32) {
    %c0_i32 = arith.constant 0 : i32
    %c0_i32_0 = arith.constant 0 : i32
    %c0_i32_1 = arith.constant 0 : i32
    return %c0_i32, %c0_i32_0 : i32, i32
  }
  func.func @transform_5(%arg0: i32) -> (i32, i32) {
    %c0_i32 = arith.constant 0 : i32
    %c0_i32_0 = arith.constant 0 : i32
    %c0_i32_1 = arith.constant 0 : i32
    return %c0_i32, %c0_i32_0 : i32, i32
  }
}

module attributes {stable_mosaic.version = 11 : i64} {
  func.func @_gate_bcast_kernel(%arg0: i32, %arg1: memref<32x1xf32, #tpu.memory_space<vmem>>, %arg2: memref<32x256xf32, #tpu.memory_space<vmem>>, %arg3: memref<32x256xf32, #tpu.memory_space<vmem>>) attributes {dimension_semantics = [#tpu.dimension_semantics<parallel>], iteration_bounds = array<i64: 1>, scalar_prefetch = 0 : i64, scratch_operands = 0 : i64, tpu.core_type = #tpu.core_type<tc>, window_params = [{transform_indices = @transform_0, window_bounds = array<i64: 32, 1>}, {transform_indices = @transform_1, window_bounds = array<i64: 32, 256>}, {transform_indices = @transform_2, window_bounds = array<i64: 32, 256>}]} {
    %c0 = arith.constant 0 : index
    %c0_0 = arith.constant 0 : index
    %0 = vector.load %arg1[%c0, %c0_0] : memref<32x1xf32, #tpu.memory_space<vmem>>, vector<32x1xf32>
    %1 = arith.negf %0 : vector<32x1xf32>
    %2 = math.exp %1 : vector<32x1xf32>
    %cst = arith.constant 1.000000e+00 : f32
    %3 = vector.broadcast %cst : f32 to vector<32x1xf32>
    %4 = arith.addf %3, %2 : vector<32x1xf32>
    %5 = arith.divf %3, %4 : vector<32x1xf32>
    %c0_1 = arith.constant 0 : index
    %c0_2 = arith.constant 0 : index
    %6 = vector.load %arg2[%c0_1, %c0_2] : memref<32x256xf32, #tpu.memory_space<vmem>>, vector<32x256xf32>
    %7 = vector.broadcast %5 : vector<32x1xf32> to vector<32x256xf32>
    %8 = arith.mulf %7, %6 : vector<32x256xf32>
    %c0_3 = arith.constant 0 : index
    %c0_4 = arith.constant 0 : index
    %9 = vector.load %arg3[%c0_3, %c0_4] : memref<32x256xf32, #tpu.memory_space<vmem>>, vector<32x256xf32>
    tpu.vector_store %arg3[%c0_3, %c0_4], %8 {strides = array<i32>} : memref<32x256xf32, #tpu.memory_space<vmem>>, vector<32x256xf32>,
    return
  }
  func.func @transform_0(%arg0: i32) -> (i32, i32) {
    %c0_i32 = arith.constant 0 : i32
    %c0_i32_0 = arith.constant 0 : i32
    return %arg0, %c0_i32 : i32, i32
  }
  func.func @transform_1(%arg0: i32) -> (i32, i32) {
    %c0_i32 = arith.constant 0 : i32
    %c0_i32_0 = arith.constant 0 : i32
    return %arg0, %c0_i32 : i32, i32
  }
  func.func @transform_2(%arg0: i32) -> (i32, i32) {
    %c0_i32 = arith.constant 0 : i32
    %c0_i32_0 = arith.constant 0 : i32
    return %arg0, %c0_i32 : i32, i32
  }
}

</mosaic_0001>

<bundles_post_ra>
// kernel: se_module_diff_pallas.3
= control target key start
LH: loop header
LB: loop body
LE: loop exit
PB: predicated region body
PF: predicated region fallthrough
CT: control target
= control target key end

     0   :  { %vm32_vm0 = vcmask 7168   ;;  %s87_s0 = inlined_call_operand.vmem [shape: f32[32,256], index: 0, kind: input, shape index: {}]   ;;  %s88_s1 = inlined_call_operand.vmem [shape: f32[32,1], index: 1, kind: output, shape index: {}]  }
   0x1   :  { %v12_v0 = vld [vmem:[%s87_s0 + $0x20] sm:$0xff]  ;;  %v13_v1 = vld [vmem:[%s87_s0 + $0x28] sm:$0xff]  ;;  %v14_v5 = vld [vmem:[%s87_s0 + $0x30] sm:$0xff] }
   0x2   :  { %v8_v2 = vld [vmem:[%s87_s0] sm:$0xff]  ;;  %v22_v3 = vadd.f32 %v13_v1, %v12_v0  ;;  %v9_v4 = vld [vmem:[%s87_s0 + $0x8] sm:$0xff]  ;;  %v15_v6 = vld [vmem:[%s87_s0 + $0x38] sm:$0xff] }
   0x3   :  { %v16_v7 = vadd.f32 %v9_v4, %v8_v2  ;;  %v10_v8 = vld [vmem:[%s87_s0 + $0x10] sm:$0xff]  ;;  %v11_v9 = vld [vmem:[%s87_s0 + $0x18] sm:$0xff]  ;;  %v25_v10 = vadd.f32 %v15_v6, %v14_v5 }
   0x4   :  { %23 = vadd.xlane.f32.xlu1 %v22_v3  ;;  %v19_v11 = vadd.f32 %v11_v9, %v10_v8 }
   0x5   :  { %17 = vadd.xlane.f32.xlu0 %v16_v7 }
   0x8   :  { %26 = vadd.xlane.f32.xlu1 %v25_v10 }
   0x9   :  { %20 = vadd.xlane.f32.xlu0 %v19_v11 }
  0x8d   :  { %v24_v12 = vpop.xlane.xlu1 %23 }
  0x8e   :  { %v30_v13 = vmul.f32 0.00390625, %v24_v12  ;;  %v18_v14 = vpop.xlane.xlu0 %17 }
  0x8f   :  { %v28_v15 = vmul.f32 0.00390625, %v18_v14 }
  0x90   :  { %35 = vst.msk [vmem:[%s88_s1 + $0x10] sm:$0xff] %vm32_vm0, %v30_v13 }
  0x91   :  { %33 = vst.msk [vmem:[%s88_s1] sm:$0xff] %vm32_vm0, %v28_v15  ;;  %v27_v16 = vpop.xlane.xlu1 %26 }
  0x92   :  { %v31_v17 = vmul.f32 0.00390625, %v27_v16  ;;  %v21_v18 = vpop.xlane.xlu0 %20 }
  0x93   :  { %v29_v19 = vmul.f32 0.00390625, %v21_v18 }
  0x94   :  { %36 = vst.msk [vmem:[%s88_s1 + $0x18] sm:$0xff] %vm32_vm0, %v31_v17 }
  0x95   :  { %34 = vst.msk [vmem:[%s88_s1 + $0x8] sm:$0xff] %vm32_vm0, %v29_v19 }

// kernel: se_module_diff_pallas.4
= control target key start
LH: loop header
LB: loop body
LE: loop exit
PB: predicated region body
PF: predicated region fallthrough
CT: control target
= control target key end

     0   :  { %v231_v0 = vmov 0.0   ;;  %vm232_vm0 = vmmov 0   ;;  %vm30_vm1 = vcmask 130048   ;;  %vm123_vm2 = vcmask 1043456   ;;  %s286_s1 = inlined_call_operand.vmem [shape: f32[16,4], index: 1, kind: input, shape index: {}]   ;;  %s287_s0 = inlined_call_operand.vmem [shape: f32[8,16], index: 0, kind: input, shape index: {}]   ;;  %s288_s3 = inlined_call_operand.vmem [shape: f32[4,16], index: 3, kind: input, shape index: {}]   ;;  %s289_s2 = inlined_call_operand.vmem [shape: f32[1,4], index: 2, kind: input, shape index: {}]   ;;  %s290_s4 = inlined_call_operand.vmem [shape: f32[1,16], index: 4, kind: input, shape index: {}]   ;;  %s291_s5 = inlined_call_operand.vmem [shape: f32[8,16], index: 5, kind: output, shape index: {}]  }
   0x1   :  { %213 = vmatprep.subr.mxu0 %v231_v0  ;;  %v22_v1 = vld [vmem:[%s286_s1 + $0x8] sm:$0xff]  ;;  %v21_v2 = vld [vmem:[%s286_s1] sm:$0xff]  ;;  %217 = vmatprep.mubr.msk.f32.mxu0 %vm232_vm0, %v231_v0  ;;  %vm119_vm3 = vcmask 31744  }
   0x2   :  { %214 = vmatpush3.msra.mxu0 %v22_v1  ;;  %v20_v3 = vld [vmem:[%s287_s0] sm:$0xff]  ;;  %220 = vmatprep.subr.mxu1 %v231_v0 }
   0x3   :  { %215 = vmatprep.subr.mxu0 %v231_v0  ;;  %222 = vmatprep.mubr.msk.f32.mxu1 %vm232_vm0, %v231_v0  ;;  %v111_v4 = vld [vmem:[%s288_s3] sm:$0xf] }
   0x4   :  { %216 = vmatpush3.msra.mxu0 %v21_v2  ;;  %221 = vmatpush3.msk.msra.mxu1 %vm123_vm2, %v111_v4  ;;  %v202_v5 = vld [vmem:[%s289_s2] ss:$0 sm:$0xff] }
   0x5   :  { %218 = vmatmul.mubr.msk.f32.vlgmr.msra.gmra.mxu0 %vm30_vm1, %v20_v3  ;;  %v205_v14 = vld [vmem:[%s290_s4] ss:$0 sm:$0xff] }
  0xc5   :  { %v100_v6 = vpop.f32.mrf.mxu0 }
  0xc6   :  { %v101_v7 = vadd.f32 %v202_v5, %v100_v6 }
  0xc7   :  { %v219_v8 = vpop.f32.mrf.mxu0 }
  0xc8   :  { %v204_v9 = vmul.f32 -1.442695, %v101_v7 }
  0xca   :  { %227 = vpow2.f32 %v204_v9 }
  0xd7   :  { %v228_v10 = vpop.eup %227 }
  0xd8   :  { %v107_v11 = vadd.f32 1.0, %v228_v10 }
  0xda   :  { %229 = vrcp.f32 %v107_v11 }
  0xe7   :  { %v230_v12 = vpop.eup %229 }
  0xe8   :  { %v110_v13 = vmul.f32 %v230_v12, %v101_v7 }
  0xea   :  { %223 = vmatmul.mubr.msk.f32.vlgmr.msra.gmra.mxu1 %vm119_vm3, %v110_v13 }
 0x1aa   :  { %v193_v15 = vpop.f32.mrf.mxu1 }
 0x1ab   :  { %v194_v16 = vadd.f32 %v205_v14, %v193_v15 }
 0x1ac   :  { %v224_v17 = vpop.f32.mrf.mxu1 }
 0x1ad   :  { %197 = vst.msk [vmem:[%s291_s5] sm:$0xff] %vm30_vm1, %v194_v16 }

// kernel: se_module_diff_pallas.5
= control target key start
LH: loop header
LB: loop body
LE: loop exit
PB: predicated region body
PF: predicated region fallthrough
CT: control target
= control target key end

     0   :  { %v110_v0 = vmov 0   ;;  %s186_s0 = inlined_call_operand.vmem [shape: f32[32,1], index: 0, kind: input, shape index: {}]   ;;  %s187_s1 = inlined_call_operand.vmem [shape: f32[32,256], index: 1, kind: input, shape index: {}]   ;;  %s188_s2 = inlined_call_operand.vmem [shape: f32[32,256], index: 2, kind: output, shape index: {}]  }
   0x1   :  { %93 = vset.pattern.permute.xlu1 %v110_v0  ;;  %92 = vset.pattern.permute.xlu0 %v110_v0  ;;  %v13_v1 = vld [vmem:[%s186_s0 + $0x10] sm:$0xff]  ;;  %v14_v2 = vld [vmem:[%s186_s0 + $0x18] sm:$0xff]  ;;  %v12_v3 = vld [vmem:[%s186_s0 + $0x8] sm:$0xff] }
   0x2   :  { %v89_v4 = vmul.f32 -1.442695, %v13_v1  ;;  %v90_v5 = vmul.f32 -1.442695, %v14_v2  ;;  %v88_v6 = vmul.f32 -1.442695, %v12_v3 }
   0x3   :  { %v11_v7 = vld [vmem:[%s186_s0] sm:$0xff]  ;;  %v44_v22 = vld [vmem:[%s187_s1 + $0x28] sm:$0xff]  ;;  %v45_v28 = vld [vmem:[%s187_s1 + $0x30] sm:$0xff] }
   0x4   :  { %94 = vpow2.f32 %v89_v4  ;;  %v87_v8 = vmul.f32 -1.442695, %v11_v7  ;;  %v43_v21 = vld [vmem:[%s187_s1 + $0x20] sm:$0xff]  ;;  %v40_v27 = vld [vmem:[%s187_s1 + $0x8] sm:$0xff]  ;;  %v46_v29 = vld [vmem:[%s187_s1 + $0x38] sm:$0xff] }
   0x5   :  { %96 = vpow2.f32 %v90_v5  ;;  %v39_v26 = vld [vmem:[%s187_s1] sm:$0xff]  ;;  %v41_v36 = vld [vmem:[%s187_s1 + $0x10] sm:$0xff]  ;;  %v42_v37 = vld [vmem:[%s187_s1 + $0x18] sm:$0xff] }
   0x6   :  { %98 = vpow2.f32 %v88_v6 }
   0x7   :  { %100 = vpow2.f32 %v87_v8 }
  0x11   :  { %v95_v9 = vpop.eup %94 }
  0x12   :  { %v97_v10 = vpop.eup %96  ;;  %v29_v11 = vadd.f32 1.0, %v95_v9 }
  0x13   :  { %v99_v12 = vpop.eup %98  ;;  %v30_v13 = vadd.f32 1.0, %v97_v10 }
  0x14   :  { %v101_v14 = vpop.eup %100  ;;  %102 = vrcp.f32 %v29_v11  ;;  %v28_v15 = vadd.f32 1.0, %v99_v12 }
  0x15   :  { %v27_v16 = vadd.f32 1.0, %v101_v14  ;;  %104 = vrcp.f32 %v30_v13 }
  0x17   :  { %106 = vrcp.f32 %v27_v16 }
  0x18   :  { %108 = vrcp.f32 %v28_v15 }
  0x21   :  { %v103_v17 = vpop.eup %102 }
  0x22   :  { %59 = vperm.xlu1 %93, %v103_v17   ;;  %v105_v18 = vpop.eup %104 }
  0x24   :  { %v107_v19 = vpop.eup %106 }
  0x25   :  { %49 = vperm.xlu0 %92, %v107_v19   ;;  %v109_v20 = vpop.eup %108 }
  0x26   :  { %64 = vperm.xlu1 %93, %v105_v18  }
  0x29   :  { %54 = vperm.xlu0 %92, %v109_v20  }
  0x9d   :  { %v60_v23 = vpop.permute.xlu1 %59 }
  0x9e   :  { %v71_v24 = vmul.f32 %v60_v23, %v43_v21  ;;  %v72_v25 = vmul.f32 %v60_v23, %v44_v22 }
  0xa0   :  { %79 = vst [vmem:[%s188_s2 + $0x20] sm:$0xff] %v71_v24  ;;  %80 = vst [vmem:[%s188_s2 + $0x28] sm:$0xff] %v72_v25  ;;  %v50_v30 = vpop.permute.xlu0 %49 }
  0xa1   :  { %v67_v31 = vmul.f32 %v50_v30, %v39_v26  ;;  %v68_v32 = vmul.f32 %v50_v30, %v40_v27  ;;  %v65_v33 = vpop.permute.xlu1 %64 }
  0xa2   :  { %v73_v34 = vmul.f32 %v65_v33, %v45_v28  ;;  %v74_v35 = vmul.f32 %v65_v33, %v46_v29 }
  0xa3   :  { %75 = vst [vmem:[%s188_s2] sm:$0xff] %v67_v31  ;;  %76 = vst [vmem:[%s188_s2 + $0x8] sm:$0xff] %v68_v32 }
  0xa4   :  { %81 = vst [vmem:[%s188_s2 + $0x30] sm:$0xff] %v73_v34  ;;  %82 = vst [vmem:[%s188_s2 + $0x38] sm:$0xff] %v74_v35  ;;  %v55_v38 = vpop.permute.xlu0 %54 }
  0xa5   :  { %v69_v39 = vmul.f32 %v55_v38, %v41_v36  ;;  %v70_v40 = vmul.f32 %v55_v38, %v42_v37 }
  0xa7   :  { %77 = vst [vmem:[%s188_s2 + $0x10] sm:$0xff] %v69_v39  ;;  %78 = vst [vmem:[%s188_s2 + $0x18] sm:$0xff] %v70_v40 }

</bundles_post_ra>
